<compile_context>
chip_gen: v6e
topology: v6e:2x2x1
jax: 0.10.0
libtpu: 0.0.40
codegen_flags: <defaults>
</compile_context>

<pallas_src>
import math

import jax
import jax.numpy as jnp
from jax.experimental import pallas as pl
from jax.experimental.pallas import tpu as pltpu

_SHIFT = math.log(2.0)  # matches torch.log(torch.tensor(2.0)).item()
_LANES = 128
_MIN_GRID_STEPS = 8                       # keep enough steps for v7x megacore
_DEFAULT_MIN_PALLAS_ELEMENTS = 1 << 18    # below this, fused XLA is faster


def _shifted_softplus_kernel(x_ref, o_ref):
    x = x_ref[...].astype(jnp.float32)
    # Numerically stable softplus: max(x, 0) + log1p(exp(-|x|))
    sp = jnp.maximum(x, 0.0) + jnp.log1p(jnp.exp(-jnp.abs(x)))
    o_ref[...] = (sp - _SHIFT).astype(o_ref.dtype)


def _vmem_capacity_bytes(default=64 << 20):
    """Physical VMEM per TensorCore; conservative (v7x) fallback if unknown."""
    try:
        cap = int(pltpu.get_tpu_info().vmem_capacity_bytes)
        if cap > 0:
            return cap
    except Exception:
        pass
    return default


def _run_pallas_slab(slab):
    """Run the kernel over a (rows, 128) slab with generation-aware tiling."""
    rows, lanes = slab.shape
    dtype = slab.dtype
    itemsize = jnp.dtype(dtype).itemsize
    # Native sublane multiple: 8 for 4-byte, 16 for 2-byte, 32 for 1-byte types.
    sublane = max(8, 32 // max(1, itemsize))

    vmem_cap = _vmem_capacity_bytes()
    # in + out, double-buffered => ~4 live tiles. 16 MiB tiles on v5e/v6e
    # (128 MiB VMEM), 8 MiB on v7x (64 MiB VMEM).
    target_tile_bytes = max(1 << 20, min(16 << 20, vmem_cap // 8))
    vmem_limit_bytes = int(min((vmem_cap * 3) // 4,
                               4 * target_tile_bytes + (8 << 20)))

    tile_rows = max(sublane,
                    ((target_tile_bytes // (lanes * itemsize)) // sublane) * sublane)
    # Cap the block so the grid has >= _MIN_GRID_STEPS steps when there is
    # enough work: lets dimension_semantics=("parallel",) shard the stream
    # across both v7x TensorCores instead of producing grid=(1,).
    split_rows = -(-rows // _MIN_GRID_STEPS)            # cdiv
    split_rows = -(-split_rows // sublane) * sublane    # round up to sublane
    block_rows = min(tile_rows, split_rows)
    if block_rows >= rows:
        block_rows = rows  # full extent is always a legal block shape

    grid = (pl.cdiv(rows, block_rows),)

    return pl.pallas_call(
        _shifted_softplus_kernel,
        out_shape=jax.ShapeDtypeStruct((rows, lanes), dtype),
        grid_spec=pltpu.PrefetchScalarGridSpec(
            num_scalar_prefetch=0,
            grid=grid,
            in_specs=[pl.BlockSpec((block_rows, lanes), lambda i: (i, 0))],
            out_specs=pl.BlockSpec((block_rows, lanes), lambda i: (i, 0)),
        ),
        compiler_params=pltpu.CompilerParams(
            dimension_semantics=("parallel",),
            vmem_limit_bytes=vmem_limit_bytes,
        ),
    )(slab)


def shifted_softplus(x, *, min_pallas_elements=_DEFAULT_MIN_PALLAS_ELEMENTS):
    """Elementwise shifted softplus: softplus(x) - log(2).

    Float inputs keep their dtype. Tiny / non-float inputs fall back to plain
    XLA (a standalone pallas_call is a fusion-breaking custom-call boundary).
    """
    n = x.size
    dtype = x.dtype
    if n == 0 or not jnp.issubdtype(dtype, jnp.floating) or n < min_pallas_elements:
        return jax.nn.softplus(x) - _SHIFT

    orig_shape = x.shape
    flat = jnp.ravel(x)

    n_main = (n // _LANES) * _LANES
    if n_main == 0:
        # Fewer than 128 elements: not worth a kernel launch.
        return jax.nn.softplus(x) - _SHIFT

    if n_main == n:
        # 128-aligned: zero-copy reshape, single read + write pass over HBM.
        out = _run_pallas_slab(flat.reshape(n // _LANES, _LANES))
        return out.reshape(orig_shape)

    # Unaligned: kernel on the 128-aligned prefix, plain XLA on the ragged
    # (<128-element) tail -- avoids padding/slicing the whole tensor.
    main = flat[:n_main].reshape(n_main // _LANES, _LANES)
    main_out = _run_pallas_slab(main).reshape(-1)
    tail = flat[n_main:]
    tail_out = (jax.nn.softplus(tail.astype(jnp.float32)) - _SHIFT).astype(dtype)
    out_flat = jnp.concatenate([main_out, tail_out])
    return out_flat.reshape(orig_shape)


if __name__ == "__main__":
    key = jax.random.PRNGKey(0)

    # NCHW-ish input consistent with the activation module (batch=2, ch=4, 16x16).
    x = jax.random.normal(key, (2, 4, 16, 16), dtype=jnp.float32) * 3.0
    ref = jax.nn.softplus(x) - math.log(2.0)

    # Default path (small tensor -> fused-XLA fast path).
    y_fast = shifted_softplus(x)
    # Force the Pallas kernel path on the same small, 128-aligned input.
    y_kernel = shifted_softplus(x, min_pallas_elements=0)
    jax.block_until_ready((y_fast, y_kernel))

    assert y_fast.shape == x.shape and y_fast.dtype == x.dtype
    assert y_kernel.shape == x.shape and y_kernel.dtype == x.dtype
    assert jnp.allclose(y_fast, ref, atol=1e-5, rtol=1e-5)
    assert jnp.allclose(y_kernel, ref, atol=1e-5, rtol=1e-5)

    # Non-128-aligned shape: exercises the aligned-prefix + ragged-tail path.
    x2 = jax.random.normal(jax.random.PRNGKey(1), (3, 5, 67), dtype=jnp.float32)
    y2 = shifted_softplus(x2, min_pallas_elements=0)
    jax.block_until_ready(y2)
    ref2 = jax.nn.softplus(x2) - math.log(2.0)
    assert y2.shape == x2.shape and y2.dtype == x2.dtype
    assert jnp.allclose(y2, ref2, atol=1e-5, rtol=1e-5)

    # Tiny unaligned (< 128 elements): pure-XLA fallback.
    x3 = jax.random.normal(jax.random.PRNGKey(2), (3, 5, 7), dtype=jnp.float32)
    y3 = shifted_softplus(x3, min_pallas_elements=0)
    jax.block_until_ready(y3)
    assert jnp.allclose(y3, jax.nn.softplus(x3) - math.log(2.0), atol=1e-5, rtol=1e-5)

    print("KERNEL_OK")
</pallas_src>

<mosaic_0001>
module attributes {stable_mosaic.version = 11 : i64} {
  func.func @_shifted_softplus_kernel(%arg0: i32, %arg1: memref<8x128xf32, #tpu.memory_space<vmem>>, %arg2: memref<8x128xf32, #tpu.memory_space<vmem>>) attributes {dimension_semantics = [#tpu.dimension_semantics<parallel>], iteration_bounds = array<i64: 2>, scalar_prefetch = 0 : i64, scratch_operands = 0 : i64, tpu.core_type = #tpu.core_type<tc>, window_params = [{transform_indices = @transform_0, window_bounds = array<i64: 8, 128>}, {transform_indices = @transform_1, window_bounds = array<i64: 8, 128>}]} {
    %c0 = arith.constant 0 : index
    %c0_0 = arith.constant 0 : index
    %0 = vector.load %arg1[%c0, %c0_0] : memref<8x128xf32, #tpu.memory_space<vmem>>, vector<8x128xf32>
    %cst = arith.constant 0.000000e+00 : f32
    %1 = vector.broadcast %cst : f32 to vector<8x128xf32>
    %2 = arith.maximumf %0, %1 : vector<8x128xf32>
    %3 = math.absf %0 : vector<8x128xf32>
    %cst_1 = arith.constant 0.000000e+00 : f32
    %4 = vector.broadcast %cst_1 : f32 to vector<8x128xf32>
    %5 = arith.subf %4, %3 : vector<8x128xf32>
    %6 = math.exp %5 : vector<8x128xf32>
    %7 = math.log1p %6 : vector<8x128xf32>
    %8 = arith.addf %2, %7 : vector<8x128xf32>
    %cst_2 = arith.constant 0.693147182 : f32
    %9 = vector.broadcast %cst_2 : f32 to vector<8x128xf32>
    %10 = arith.subf %8, %9 : vector<8x128xf32>
    %c0_3 = arith.constant 0 : index
    %c0_4 = arith.constant 0 : index
    %11 = vector.load %arg2[%c0_3, %c0_4] : memref<8x128xf32, #tpu.memory_space<vmem>>, vector<8x128xf32>
    tpu.vector_store %arg2[%c0_3, %c0_4], %10 {strides = array<i32>} : memref<8x128xf32, #tpu.memory_space<vmem>>, vector<8x128xf32>,
    return
  }
  func.func @transform_0(%arg0: i32) -> (i32, i32) {
    %c0_i32 = arith.constant 0 : i32
    %c0_i32_0 = arith.constant 0 : i32
    return %arg0, %c0_i32 : i32, i32
  }
  func.func @transform_1(%arg0: i32) -> (i32, i32) {
    %c0_i32 = arith.constant 0 : i32
    %c0_i32_0 = arith.constant 0 : i32
    return %arg0, %c0_i32 : i32, i32
  }
}

</mosaic_0001>

<bundles_post_ra>
// kernel: tpu_custom_call.1
= control target key start
LH: loop header
LB: loop body
LE: loop exit
PB: predicated region body
PF: predicated region fallthrough
CT: control target
= control target key end

     0   :  { %6 = vsyncpa [#allocation3], 0  ;;  %s544_s0 = inlined_call_operand.hbm [shape: f32[16,128], index: 0, kind: input, shape index: {}]   ;;  %s545_s1 = inlined_call_operand.hbm [shape: f32[16,128], index: 1, kind: output, shape index: {}]  }
   0x1   :  { %8 = vsyncpa [#allocation3 + $0x1], 0 }
   0x2   :  { %9 = vsyncpa [#allocation4], 0 }
   0x3   :  { %11 = vsyncpa [#allocation4 + $0x1], 0  ;;  %s403_s6 = smov 0   ;;  %s405_s7 = smov 0  }
   0x4   :  { %s407_s8 = smov 0   ;;  %s409_s9 = smov 0  }
   0x5 LB: > { %s424_s10 = sadd.s32 4294967295, %s389_s9   ;;  %s234_s11 = sadd.s32 4294967294, %s389_s9   ;;  %s389_s9 = sphi %s409_s9, %s562_s9   ;;  %s385_s8 = sphi %s407_s8, %s561_s8   ;;  %s381_s7 = sphi %s405_s7, %s560_s7   ;;  %s377_s6 = sphi %s403_s6, %s559_s6  }
   0x6   : > { %s428_s12 = sadd.s32 1, %s389_s9   ;;  %s24_s13 = sadd.s32 1, %s385_s8 }
   0x7   : > { %s21_s14 = ssub.s32 %s389_s9, %s428_s12  ;;  %p31_p0 = scmp.ne.s32.totalorder %s385_s8, %s381_s7 }
   0x8   : > { %p22_p1 = scmp.eq.s32.totalorder %s21_s14, 0  ;;  %p32_p2 = scmp.eq.s32.totalorder %s389_s9, 0 }
   0x9   : > { %p37_p3 = scmp.ne.s32.totalorder %s381_s7, %s377_s6  ;;  %p38_p4 = scmp.eq.s32.totalorder %s424_s10, 0 }
   0xa   : > { %s440_s15 = scalar_select %p22_p1, %s385_s8, %s24_s13  }
   0xb   : > { %p442_p5 = por %p32_p2, %p31_p0  ;;  %p446_p6 = por %p38_p4, %p37_p3 }
   0xc   : > { %p61_p7 = scmp.eq.s32.totalorder %s424_s10, 1  ;;  %p67_p8 = scmp.eq.s32.totalorder %s234_s11, 1 }
   0xd   : > { %s549_s17 = scalar_select %p446_p6, 1, 0 }
   0xe   : > { %p259_p10 = scmp.lt.s32.totalorder %s389_s9, 2  ;;  %p453_p11 = por %p61_p7, %p31_p0 }
   0xf   : > { %p457_p12 = por %p67_p8, %p37_p3  ;;  %s87_s20 = sand.u32 1, %s385_s8  }
  0x10   : > { %s550_s18 = scalar_select %p453_p11, 1, 0 }
  0x11   : > { %s551_s19 = scalar_select %p457_p12, 1, 0 }
  0x12   : > { %s238_s21 = sshll.u32 %s389_s9, 7  ;;  %s237_s22 = sshll.u32 %s87_s20, 3 }
  0x13   : > { %s466_s25 = scalar_lea.hbm %s544_s0, %s238_s21  ;;  %s91_s26 = scalar_lea.vmem [#allocation2], %s237_s22 }
  0x14   : > { %s98_s27 = sshll.u32 %s91_s26, 4  ;;  %p470_p13 = pnand %p259_p10, %p442_p5  ;;  %s474_s27 = int_to_ptr.vmem [resolvable:$true] %s98_s27 }
  0x15   : > { %s88_s29 = scalar_lea.sflag [#allocation3], %s87_s20  ;;  %s297_s30 = scalar_lea.hbm %s466_s25, 128 }
  0x16   : > { %p298_p2 = scmp.ne.s32.totalorder %s466_s25, %s297_s30  ;;  %p299_p3 = pneg %p470_p13 }
  0x17   : > { %s302_s4 = scalar_lea.hbm %s544_s0, 256  ;;  %p303_p5 = scmp.lt.s32.totalorder %s466_s25, %s544_s0 }
  0x18   : > { %p300_p4 = pnand %p299_p3, %p298_p2  ;;  %p304_p8 = scmp.lt.s32.totalorder %s302_s4, %s297_s30 }
  0x1a   : > { %p301_p7 = pneg %p300_p4  ;;  %p305_p10 = por %p304_p8, %p303_p5 }
  0x1c   : > { %p306_p9 = pnand %p305_p10, %p301_p7 }
  0x1e   : > { %309 = shalt.err (!%p306_p9)
}
  0x1f   : > { %s310_s13 = scalar_lea.vmem %s474_s27, 128  ;;  %s391_s14 = smov [#allocation2]  }
  0x20   : > { %p311_p0 = scmp.ne.s32.totalorder %s474_s27, %s310_s13  ;;  %s315_s16 = sshll.u32 %s391_s14, 4  ;;  %s316_s16 = int_to_ptr.vmem [resolvable:$false] %s315_s16 }
  0x21   : > { %s317_s20 = scalar_lea.vmem %s316_s16, 256  ;;  %p318_p4 = scmp.lt.s32.totalorder %s474_s27, %s316_s16 }
  0x22   : > { %p313_p1 = pnand %p311_p0, %p299_p3  ;;  %p319_p12 = scmp.lt.s32.totalorder %s317_s20, %s310_s13 }
  0x24   : > { %p314_p2 = pneg %p313_p1  ;;  %p320_p11 = por %p319_p12, %p318_p4 }
  0x26   : > { %p321_p6 = pnand %p320_p11, %p314_p2 }
  0x28   : > { %324 = shalt.err (!%p321_p6)
}
  0x29   : > { %254 = dma.hbm_to_vmem [thread:$0]  (!%p470_p13), %s466_s25, 128, %s474_s27, %s88_s29  }
  0x2a   : > { %p553_p9 = scmp.lt.s32.totalorder %s389_s9, 3  ;;  %p554_p7 = scmp.ge.s32.totalorder %s389_s9, 1 }
  0x2c   : > { %p104_p0 = pnand %p554_p7, %p553_p9 }
  0x2d   : > { %s501_s21 = sand.u32 (!%p104_p0), 1, %s381_s7   ;;  %p555_p6 = scmp.ne.s32.totalorder (!%p104_p0), %s549_s17, 0 }
  0x2e   : > { %107 = sbr.rel (%p104_p0) target bundleno = 109 (0x6d), region = 24  ;;  %s240_s22 = sshll.u32 (!%p104_p0), %s501_s21, 3 }
  0x2f   : > { %s110_s23 = scalar_lea.sflag (!%p104_p0), [#allocation3], %s501_s21  ;;  %s113_s24 = scalar_lea.vmem (!%p104_p0), [#allocation2], %s240_s22 }
  0x33   : > { %368 = dma.done.wait (%p555_p6), %s110_s23, 128  }
  0x34   : > { %370 = vsyncadd (%p555_p6), %s110_s23, 4294967168  ;;  %v132_v0 = vld [vmem:[%s113_s24] sm:$0xff]  ;;  %s131_s17 = scalar_lea.vmem [#allocation5], %s240_s22  ;;  %s244_s26 = sshll.u32 %s424_s10, 7 }
  0x35   : > { %v134_v1 = vand.u32 2147483647, %v132_v0  ;;  %v133_v11 = vmax.f32 %v132_v0, 0.0  ;;  %s164_s25 = sshll.u32 %s131_s17, 4  ;;  %s162_s29 = scalar_lea.hbm %s545_s1, %s244_s26  ;;  %s165_s25 = int_to_ptr.vmem [resolvable:$true] %s164_s25 }
  0x36   : > { %s151_s30 = scalar_lea.sflag [#allocation4], %s501_s21  ;;  %s325_s2 = scalar_lea.vmem %s165_s25, 128 }
  0x37   : > { %v135_v2 = vsub.f32 0.0, %v134_v1  ;;  %p326_p11 = scmp.ne.s32.totalorder %s165_s25, %s325_s2  ;;  %p556_p12 = scmp.ne.s32.totalorder %s550_s18, 0 }
  0x38   : > { %s392_s3 = smov [#allocation5]  }
  0x39   : > { %v136_v3 = vmul.f32 1.442695, %v135_v2  ;;  %p327_p13 = pnand %p326_p11, %p556_p12  ;;  %s329_s4 = sshll.u32 %s392_s3, 4  ;;  %s330_s4 = int_to_ptr.vmem [resolvable:$false] %s329_s4 }
  0x3a   : > { %s331_s5 = scalar_lea.vmem %s330_s4, 256  ;;  %p332_p3 = scmp.lt.s32.totalorder %s165_s25, %s330_s4 }
  0x3b   : > { %293 = vpow2.f32 %v136_v3  ;;  %p328_p1 = pneg %p327_p13  ;;  %p333_p5 = scmp.lt.s32.totalorder %s331_s5, %s325_s2 }
  0x3d   : > { %p334_p8 = por %p333_p5, %p332_p3 }
  0x3f   : > { %p335_p10 = pnand %p334_p8, %p328_p1 }
  0x48   : > { %v294_v4 = vpop.eup %293 }
  0x49   : > { %v138_v5 = vadd.f32 1.0, %v294_v4  ;;  %v141_v6 = vmul.f32 -0.5, %v294_v4  ;;  %v144_v8 = vand.u32 2147483647, %v294_v4 }
  0x4b   : > { %295 = vlog2.f32 %v138_v5  ;;  %v142_v7 = vadd.f32 1.0, %v141_v6  ;;  %vm145_vm0 = vcmp.lt.f32.partialorder %v144_v8, 0.0004427343 }
  0x4d   : > { %v143_v9 = vmul.f32 %v294_v4, %v142_v7 }
  0x58   : > { %v296_v10 = vpop.eup %295 }
  0x59   : > { %v140_v12 = vmul.f32 0.6931472, %v296_v10 }
  0x5b   : > { %v146_v13 = vsel %vm145_vm0, %v143_v9, %v140_v12 }
  0x5c   : > { %v147_v14 = vadd.f32 %v146_v13, %v133_v11 }
  0x5e   : > { %v242_v15 = vadd.f32 -0.6931472, %v147_v14 }
  0x60   : > { %149 = vst [vmem:[%s131_s17] sm:$0xff] %v242_v15 }
  0x61   : > { %338 = shalt.err (!%p335_p10)
}
  0x62   : > { %s339_s10 = scalar_lea.hbm %s162_s29, 128  ;;  %s343_s14 = scalar_lea.hbm %s545_s1, 256 }
  0x63   : > { %p340_p2 = scmp.ne.s32.totalorder %s162_s29, %s339_s10  ;;  %p344_p7 = scmp.lt.s32.totalorder %s162_s29, %s545_s1 }
  0x64   : > { %p345_p0 = scmp.lt.s32.totalorder %s343_s14, %s339_s10 }
  0x65   : > { %p341_p4 = pnand %p340_p2, %p556_p12 }
  0x66   : > { %p346_p6 = por %p345_p0, %p344_p7 }
  0x67   : > { %p342_p9 = pneg %p341_p4 }
  0x69   : > { %p347_p11 = pnand %p346_p6, %p342_p9 }
  0x6b   : > { %350 = shalt.err (!%p347_p11)
}
  0x6c   : > { %249 = dma.vmem_to_hbm [thread:$0]  (%p556_p12), %s165_s25, 128, %s162_s29, %s151_s30  }
  0x6d PF: > { %s176_s21 = sand.u32 1, %s377_s6   ;;  %p557_p13 = scmp.ne.s32.totalorder %s551_s19, 0 }
  0x6e   : > { %p558_p1 = scmp.ge.s32.totalorder %s389_s9, 2  ;;  %s177_s22 = scalar_lea.sflag [#allocation4], %s176_s21 }
  0x70   : > { %p256_p3 = pnand %p558_p1, %p557_p13 }
  0x72   : > { %p257_p5 = pneg %p256_p3 }
  0x74   : > { %372 = dma.done.wait (%p257_p5), %s177_s22, 128  }
  0x75   : > { %374 = vsyncadd (%p257_p5), %s177_s22, 4294967168  ;;  %p14_p8 = scmp.ge.s32.totalorder %s428_s12, 4   ;;  %s559_s6 = smov %s381_s7 }
  0x76   : > { %s560_s7 = smov %s385_s8  ;;  %s561_s8 = smov %s440_s15 }
  0x77   : > { %s562_s9 = smov %s428_s12  ;;  %16 = sbr.rel (!%p14_p8) target bundleno = 5 (0x5), region = 69 }
  0x7c   :  { %182 = vsyncpa [#allocation3], 1 }
  0x7d   :  { %184 = vsyncpa [#allocation3 + $0x1], 1 }
  0x7e   :  { %185 = vsyncpa [#allocation4], 1 }
  0x7f   :  { %187 = vsyncpa [#allocation4 + $0x1], 1 }

</bundles_post_ra>
